<compile_context>
chip_gen: v5e
topology: v5e:2x2
jax: 0.10.0
libtpu: 0.0.40
codegen_flags: <defaults>
</compile_context>

<pallas_src>
import functools

import jax
import jax.numpy as jnp
from jax.experimental import pallas as pl
from jax.experimental.pallas import tpu as pltpu


def mlp_kernel(xT_ref, w1T_ref, b1_ref, w2T_ref, b2_ref, w3_ref, b3_ref, oT_ref):
    # xT_ref: (in_dim, TILE_B); activations keep batch on the lane axis.

    # Linear(8 -> 128) + ReLU    --  MXU: M=128, K=8, N=TILE_B
    h1 = jnp.dot(w1T_ref[...], xT_ref[...], preferred_element_type=jnp.float32)
    h1 = jnp.maximum(h1 + b1_ref[...], 0.0)                       # (128, TILE_B) f32

    # Linear(128 -> 64) + ReLU   --  MXU: M=64, K=128, N=TILE_B
    h2 = jnp.dot(w2T_ref[...], h1.astype(w2T_ref.dtype),
                 preferred_element_type=jnp.float32)
    h2 = jnp.maximum(h2 + b2_ref[...], 0.0)                       # (64, TILE_B) f32

    # Linear(64 -> 1): VPU multiply + XLU sublane-reduce instead of an N=1 matmul.
    logits = jnp.sum(h2 * w3_ref[...], axis=0, keepdims=True) + b3_ref[...]  # (1, TILE_B)

    # Exact sigmoid.  The block is only (1, TILE_B) so the full-precision divide
    # is negligible; the formula is overflow-safe (exp(-x)->inf gives 0,
    # exp(-x)->0 gives 1).
    oT_ref[...] = 1.0 / (1.0 + jnp.exp(-logits))


@functools.partial(jax.jit, static_argnames=("tile_b", "use_bf16"))
def ann_model_forward(x, params, *, tile_b=512, use_bf16=False):
    """x: (B, input_dim) float32 -> (B, 1) float32.

    params are PyTorch-equivalent weights stored as (in, out) + (1, out) biases.
    """
    w1, b1, w2, b2, w3, b3 = params
    B, in_dim = x.shape
    h1_dim, h2_dim, out_dim = w1.shape[1], w2.shape[1], w3.shape[1]
    assert out_dim == 1  # lane-dense output path specialized for output_dim == 1

    # Lane-dense tiles: batch lives on the lane axis, so TILE_B must be a
    # multiple of 128.  Keep TILE_B modest so it also fits v7x's 64 MiB VMEM.
    tile_b = max(128, (tile_b // 128) * 128)
    n_blocks = pl.cdiv(B, tile_b)
    b_pad = n_blocks * tile_b

    # Transposed layouts: activations = (features, batch).
    x_pad = jnp.pad(x, ((0, b_pad - B), (0, 0)))
    xT = x_pad.T                                   # (in_dim, Bp)
    w1T = w1.T                                     # (128, in_dim)
    w2T = w2.T                                     # (64, 128)
    b1c = b1.reshape(h1_dim, 1)                    # (128, 1)
    b2c = b2.reshape(h2_dim, 1)                    # (64, 1)
    w3c = w3.reshape(h2_dim, 1)                    # (64, 1)
    b3s = b3.reshape(1, 1)                         # (1, 1)

    if use_bf16:  # bf16 MXU operands (v6e/v7x); accumulation stays f32.
        xT = xT.astype(jnp.bfloat16)
        w1T = w1T.astype(jnp.bfloat16)
        w2T = w2T.astype(jnp.bfloat16)

    resident = lambda shape: pl.BlockSpec(shape, lambda i: (0, 0))

    out_T = pl.pallas_call(
        mlp_kernel,
        out_shape=jax.ShapeDtypeStruct((1, b_pad), jnp.float32),
        grid=(n_blocks,),
        in_specs=[
            pl.BlockSpec((in_dim, tile_b), lambda i: (0, i)),   # x tile (pipelined)
            resident((h1_dim, in_dim)),                         # w1^T   (VMEM-resident)
            resident((h1_dim, 1)),                              # b1
            resident((h2_dim, h1_dim)),                         # w2^T
            resident((h2_dim, 1)),                              # b2
            resident((h2_dim, 1)),                              # w3 column
            resident((1, 1)),                                   # b3
        ],
        out_specs=pl.BlockSpec((1, tile_b), lambda i: (0, i)),  # lane-dense output
        compiler_params=pltpu.CompilerParams(
            dimension_semantics=("parallel",),                  # megacore on v7x
        ),
    )(xT, w1T, b1c, w2T, b2c, w3c, b3s)

    return out_T[0, :B].reshape(B, out_dim)


def init_params(key, input_dim=8, output_dim=1):
    """Deterministic PyTorch-style uniform(-1/sqrt(fan_in), 1/sqrt(fan_in)) init."""
    dims = [(input_dim, 128), (128, 64), (64, output_dim)]
    params = []
    for fan_in, fan_out in dims:
        key, kw, kb = jax.random.split(key, 3)
        bound = 1.0 / jnp.sqrt(float(fan_in))
        w = jax.random.uniform(kw, (fan_in, fan_out), jnp.float32, -bound, bound)
        b = jax.random.uniform(kb, (1, fan_out), jnp.float32, -bound, bound)
        params += [w, b]
    return tuple(params)


def reference_forward(x, params):
    w1, b1, w2, b2, w3, b3 = params
    h1 = jnp.maximum(x @ w1 + b1, 0.0)
    h2 = jnp.maximum(h1 @ w2 + b2, 0.0)
    return jax.nn.sigmoid(h2 @ w3 + b3)


if __name__ == "__main__":
    key = jax.random.PRNGKey(0)
    key, kx1, kx2 = jax.random.split(key, 3)

    input_dim, output_dim = 8, 1
    params = init_params(key, input_dim, output_dim)

    # Small batch (spec-sized) check, f32 matmul operands.
    # Tolerance accounts for the TPU default matmul precision (bf16 operand
    # rounding) used by BOTH the kernel and the eager reference; the kernel
    # itself introduces no approximations beyond that.
    x_small = jax.random.normal(kx1, (8, input_dim), jnp.float32)
    y = jax.block_until_ready(ann_model_forward(x_small, params))
    y_ref = reference_forward(x_small, params)
    assert y.shape == (8, output_dim)
    assert bool(jnp.all(jnp.isfinite(y)))
    assert jnp.allclose(y, y_ref, atol=2e-3, rtol=2e-3)

    # Larger, non-multiple batch to exercise the tiled grid + padding path.
    x_big = jax.random.normal(kx2, (300, input_dim), jnp.float32)
    y_big = jax.block_until_ready(ann_model_forward(x_big, params, tile_b=128))
    y_big_ref = reference_forward(x_big, params)
    assert y_big.shape == (300, output_dim)
    assert jnp.allclose(y_big, y_big_ref, atol=2e-3, rtol=2e-3)

    # bf16 matmul-operand path (v6e/v7x MXU); looser tolerance for bf16 operands.
    y_bf16 = jax.block_until_ready(
        ann_model_forward(x_big, params, tile_b=128, use_bf16=True))
    assert jnp.allclose(y_bf16, y_big_ref, atol=5e-2, rtol=5e-2)

    print("KERNEL_OK")
</pallas_src>

<mosaic_0001>
module attributes {stable_mosaic.version = 11 : i64} {
  func.func @mlp_kernel(%arg0: i32, %arg1: memref<8x512xf32, #tpu.memory_space<vmem>>, %arg2: memref<128x8xf32, #tpu.memory_space<vmem>>, %arg3: memref<128x1xf32, #tpu.memory_space<vmem>>, %arg4: memref<64x128xf32, #tpu.memory_space<vmem>>, %arg5: memref<64x1xf32, #tpu.memory_space<vmem>>, %arg6: memref<64x1xf32, #tpu.memory_space<vmem>>, %arg7: memref<1x1xf32, #tpu.memory_space<vmem>>, %arg8: memref<1x512xf32, #tpu.memory_space<vmem>>) attributes {dimension_semantics = [#tpu.dimension_semantics<parallel>], iteration_bounds = array<i64: 1>, scalar_prefetch = 0 : i64, scratch_operands = 0 : i64, tpu.core_type = #tpu.core_type<tc>, window_params = [{transform_indices = @transform_0, window_bounds = array<i64: 8, 512>}, {pipeline_mode = #tpu.pipeline_mode<synchronous>, transform_indices = @transform_1, window_bounds = array<i64: 128, 8>}, {pipeline_mode = #tpu.pipeline_mode<synchronous>, transform_indices = @transform_2, window_bounds = array<i64: 128, 1>}, {pipeline_mode = #tpu.pipeline_mode<synchronous>, transform_indices = @transform_3, window_bounds = array<i64: 64, 128>}, {pipeline_mode = #tpu.pipeline_mode<synchronous>, transform_indices = @transform_4, window_bounds = array<i64: 64, 1>}, {pipeline_mode = #tpu.pipeline_mode<synchronous>, transform_indices = @transform_5, window_bounds = array<i64: 64, 1>}, {pipeline_mode = #tpu.pipeline_mode<synchronous>, transform_indices = @transform_6, window_bounds = array<i64: 1, 1>}, {transform_indices = @transform_7, window_bounds = array<i64: 1, 512>}]} {
    %c0 = arith.constant 0 : index
    %c0_0 = arith.constant 0 : index
    %0 = vector.load %arg2[%c0, %c0_0] : memref<128x8xf32, #tpu.memory_space<vmem>>, vector<128x8xf32>
    %c0_1 = arith.constant 0 : index
    %c0_2 = arith.constant 0 : index
    %1 = vector.load %arg1[%c0_1, %c0_2] : memref<8x512xf32, #tpu.memory_space<vmem>>, vector<8x512xf32>
    %cst = arith.constant dense<0.000000e+00> : vector<128x512xf32>
    %2 = tpu.matmul %0, %1, %cst {dimension_numbers = #tpu.dot_dimension_numbers<[1], [0], [0], [1], [0, 0, 1, 1], [], []>} : vector<128x8xf32>, vector<8x512xf32>, vector<128x512xf32> -> vector<128x512xf32>
    %c0_3 = arith.constant 0 : index
    %c0_4 = arith.constant 0 : index
    %3 = vector.load %arg3[%c0_3, %c0_4] : memref<128x1xf32, #tpu.memory_space<vmem>>, vector<128x1xf32>
    %4 = vector.broadcast %3 : vector<128x1xf32> to vector<128x512xf32>
    %5 = arith.addf %2, %4 : vector<128x512xf32>
    %cst_5 = arith.constant 0.000000e+00 : f32
    %6 = vector.broadcast %cst_5 : f32 to vector<128x512xf32>
    %7 = arith.maximumf %5, %6 : vector<128x512xf32>
    %c0_6 = arith.constant 0 : index
    %c0_7 = arith.constant 0 : index
    %8 = vector.load %arg4[%c0_6, %c0_7] : memref<64x128xf32, #tpu.memory_space<vmem>>, vector<64x128xf32>
    %cst_8 = arith.constant dense<0.000000e+00> : vector<64x512xf32>
    %9 = tpu.matmul %8, %7, %cst_8 {dimension_numbers = #tpu.dot_dimension_numbers<[1], [0], [0], [1], [0, 0, 1, 1], [], []>} : vector<64x128xf32>, vector<128x512xf32>, vector<64x512xf32> -> vector<64x512xf32>
    %c0_9 = arith.constant 0 : index
    %c0_10 = arith.constant 0 : index
    %10 = vector.load %arg5[%c0_9, %c0_10] : memref<64x1xf32, #tpu.memory_space<vmem>>, vector<64x1xf32>
    %11 = vector.broadcast %10 : vector<64x1xf32> to vector<64x512xf32>
    %12 = arith.addf %9, %11 : vector<64x512xf32>
    %cst_11 = arith.constant 0.000000e+00 : f32
    %13 = vector.broadcast %cst_11 : f32 to vector<64x512xf32>
    %14 = arith.maximumf %12, %13 : vector<64x512xf32>
    %c0_12 = arith.constant 0 : index
    %c0_13 = arith.constant 0 : index
    %15 = vector.load %arg6[%c0_12, %c0_13] : memref<64x1xf32, #tpu.memory_space<vmem>>, vector<64x1xf32>
    %16 = vector.broadcast %15 : vector<64x1xf32> to vector<64x512xf32>
    %17 = arith.mulf %14, %16 : vector<64x512xf32>
    %cst_14 = arith.constant dense<0.000000e+00> : vector<512xf32>
    %18 = vector.multi_reduction <add>, %17, %cst_14 [0] : vector<64x512xf32> to vector<512xf32>
    %19 = vector.shape_cast %18 : vector<512xf32> to vector<1x512xf32>
    %c0_15 = arith.constant 0 : index
    %c0_16 = arith.constant 0 : index
    %20 = vector.load %arg7[%c0_15, %c0_16] : memref<1x1xf32, #tpu.memory_space<vmem>>, vector<1x1xf32>
    %21 = vector.broadcast %20 : vector<1x1xf32> to vector<1x512xf32>
    %22 = arith.addf %19, %21 : vector<1x512xf32>
    %cst_17 = arith.constant 0.000000e+00 : f32
    %23 = vector.broadcast %cst_17 : f32 to vector<1x512xf32>
    %24 = arith.subf %23, %22 : vector<1x512xf32>
    %25 = math.exp %24 : vector<1x512xf32>
    %cst_18 = arith.constant 1.000000e+00 : f32
    %26 = vector.broadcast %cst_18 : f32 to vector<1x512xf32>
    %27 = arith.addf %26, %25 : vector<1x512xf32>
    %cst_19 = arith.constant 1.000000e+00 : f32
    %28 = vector.broadcast %cst_19 : f32 to vector<1x512xf32>
    %29 = arith.divf %28, %27 : vector<1x512xf32>
    %c0_20 = arith.constant 0 : index
    %c0_21 = arith.constant 0 : index
    %30 = vector.load %arg8[%c0_20, %c0_21] : memref<1x512xf32, #tpu.memory_space<vmem>>, vector<1x512xf32>
    tpu.vector_store %arg8[%c0_20, %c0_21], %29 {strides = array<i32>} : memref<1x512xf32, #tpu.memory_space<vmem>>, vector<1x512xf32>,
    return
  }
  func.func @transform_0(%arg0: i32) -> (i32, i32) {
    %c0_i32 = arith.constant 0 : i32
    %c0_i32_0 = arith.constant 0 : i32
    return %c0_i32, %arg0 : i32, i32
  }
  func.func @transform_1(%arg0: i32) -> (i32, i32) {
    %c0_i32 = arith.constant 0 : i32
    %c0_i32_0 = arith.constant 0 : i32
    %c0_i32_1 = arith.constant 0 : i32
    return %c0_i32, %c0_i32_0 : i32, i32
  }
  func.func @transform_2(%arg0: i32) -> (i32, i32) {
    %c0_i32 = arith.constant 0 : i32
    %c0_i32_0 = arith.constant 0 : i32
    %c0_i32_1 = arith.constant 0 : i32
    return %c0_i32, %c0_i32_0 : i32, i32
  }
  func.func @transform_3(%arg0: i32) -> (i32, i32) {
    %c0_i32 = arith.constant 0 : i32
    %c0_i32_0 = arith.constant 0 : i32
    %c0_i32_1 = arith.constant 0 : i32
    return %c0_i32, %c0_i32_0 : i32, i32
  }
  func.func @transform_4(%arg0: i32) -> (i32, i32) {
    %c0_i32 = arith.constant 0 : i32
    %c0_i32_0 = arith.constant 0 : i32
    %c0_i32_1 = arith.constant 0 : i32
    return %c0_i32, %c0_i32_0 : i32, i32
  }
  func.func @transform_5(%arg0: i32) -> (i32, i32) {
    %c0_i32 = arith.constant 0 : i32
    %c0_i32_0 = arith.constant 0 : i32
    %c0_i32_1 = arith.constant 0 : i32
    return %c0_i32, %c0_i32_0 : i32, i32
  }
  func.func @transform_6(%arg0: i32) -> (i32, i32) {
    %c0_i32 = arith.constant 0 : i32
    %c0_i32_0 = arith.constant 0 : i32
    %c0_i32_1 = arith.constant 0 : i32
    return %c0_i32, %c0_i32_0 : i32, i32
  }
  func.func @transform_7(%arg0: i32) -> (i32, i32) {
    %c0_i32 = arith.constant 0 : i32
    %c0_i32_0 = arith.constant 0 : i32
    return %c0_i32, %arg0 : i32, i32
  }
}

</mosaic_0001>

<bundles_post_ra>
// kernel: ann_model_forward.1
= control target key start
LH: loop header
LB: loop body
LE: loop exit
PB: predicated region body
PF: predicated region fallthrough
CT: control target
= control target key end

     0   :  { %v1095_v0 = vmov 0   ;;  %vm144_vm0 = vcmask 64512   ;;  %s1695_s2 = inlined_call_operand.vmem [shape: f32[128,1], index: 2, kind: input, shape index: {}]   ;;  %s1696_s0 = inlined_call_operand.vmem [shape: f32[8,512], index: 0, kind: input, shape index: {}]   ;;  %s1697_s1 = inlined_call_operand.vmem [shape: f32[128,8], index: 1, kind: input, shape index: {}]   ;;  %s1698_s4 = inlined_call_operand.vmem [shape: f32[64,1], index: 4, kind: input, shape index: {}]   ;;  %s1699_s5 = inlined_call_operand.vmem [shape: f32[64,1], index: 5, kind: input, shape index: {}]   ;;  %s1700_s6 = inlined_call_operand.<no memory space> [shape: f32[1,1], index: 6, kind: input, shape index: {}]   ;;  %s1701_s3 = inlined_call_operand.vmem [shape: f32[64,128], index: 3, kind: input, shape index: {}]   ;;  %s1702_s7 = inlined_call_operand.vmem [shape: f32[1,512], index: 7, kind: output, shape index: {}]  }
   0x1   :  { %1076 = vset.pattern.permute.xlu0 %v1095_v0  ;;  %v63_v1 = vld [vmem:[%s1695_s2 + $0x78] sm:$0xff]  ;;  %v44_v2 = vld [vmem:[%s1696_s0] sm:$0xff]  ;;  %v45_v3 = vld [vmem:[%s1696_s0 + $0x8] sm:$0xff]  ;;  %1077 = vset.pattern.permute.xlu1 %v1095_v0  ;;  %v12_v53 = vstv %s1700_s6 }
   0x2   :  { %141 = vperm.xlu0 %1076, %v63_v1   ;;  %208 = vmatpush.msra.mxu0 %v44_v2  ;;  %v46_v4 = vld [vmem:[%s1696_s0 + $0x10] sm:$0xff]  ;;  %v47_v5 = vld [vmem:[%s1696_s0 + $0x18] sm:$0xff]  ;;  %v28_v6 = vld [vmem:[%s1697_s1] sm:$0xff]  ;;  %13 = vst [vmem:[#allocation2] sm:$0x1] %v12_v53 }
   0x3   :  { %273 = vmatpush.msra.mxu1 %v45_v3  ;;  %338 = vmatpush.msra.mxu2 %v46_v4  ;;  %v61_v7 = vld [vmem:[%s1695_s2 + $0x68] sm:$0xff]  ;;  %v59_v8 = vld [vmem:[%s1695_s2 + $0x58] sm:$0xff]  ;;  %v62_v9 = vld [vmem:[%s1695_s2 + $0x70] sm:$0xff] }
   0x4   :  { %403 = vmatpush.msra.mxu3 %v47_v5  ;;  %1011 = vmatmul.msk.f32.vlgmr.msra.gmra.mxu0 %vm144_vm0, %v28_v6  ;;  %v29_v10 = vld [vmem:[%s1697_s1 + $0x8] sm:$0xff]  ;;  %v60_v11 = vld [vmem:[%s1695_s2 + $0x60] sm:$0xff]  ;;  %v58_v12 = vld [vmem:[%s1695_s2 + $0x50] sm:$0xff] }
   0x5   :  { %1027 = vmatmul.msk.f32.vlgmr.msra.gmra.mxu1 %vm144_vm0, %v28_v6  ;;  %1043 = vmatmul.msk.f32.vlgmr.msra.gmra.mxu2 %vm144_vm0, %v28_v6  ;;  %v57_v13 = vld [vmem:[%s1695_s2 + $0x48] sm:$0xff]  ;;  %v30_v14 = vld [vmem:[%s1697_s1 + $0x10] sm:$0xff]  ;;  %v56_v15 = vld [vmem:[%s1695_s2 + $0x40] sm:$0xff] }
   0x6   :  { %1059 = vmatmul.msk.f32.vlgmr.msra.gmra.mxu3 %vm144_vm0, %v28_v6  ;;  %131 = vperm.xlu1 %1077, %v61_v7   ;;  %v55_v16 = vld [vmem:[%s1695_s2 + $0x38] sm:$0xff]  ;;  %v54_v17 = vld [vmem:[%s1695_s2 + $0x30] sm:$0xff]  ;;  %v53_v19 = vld [vmem:[%s1695_s2 + $0x28] sm:$0xff] }
   0x7   :  { %1078 = vset.pattern.permute.xlu2 %v1095_v0  ;;  %v31_v18 = vld [vmem:[%s1697_s1 + $0x18] sm:$0xff]  ;;  %v52_v20 = vld [vmem:[%s1695_s2 + $0x20] sm:$0xff]  ;;  %v50_v23 = vld [vmem:[%s1695_s2 + $0x10] sm:$0xff] }
   0x8   :  { %121 = vperm.xlu2 %1078, %v59_v8   ;;  %v51_v21 = vld [vmem:[%s1695_s2 + $0x18] sm:$0xff]  ;;  %v32_v22 = vld [vmem:[%s1697_s1 + $0x20] sm:$0xff]  ;;  %v49_v24 = vld [vmem:[%s1695_s2 + $0x8] sm:$0xff] }
   0x9   :  { %v48_v25 = vld [vmem:[%s1695_s2] sm:$0xff]  ;;  %v33_v26 = vld [vmem:[%s1697_s1 + $0x28] sm:$0xff]  ;;  %v34_v27 = vld [vmem:[%s1697_s1 + $0x30] sm:$0xff] }
   0xa   :  { %136 = vperm.xlu0 %1076, %v62_v9   ;;  %v35_v28 = vld [vmem:[%s1697_s1 + $0x38] sm:$0xff]  ;;  %v525_v29 = vld [vmem:[%s1698_s4] sm:$0xff]  ;;  %v527_v31 = vld [vmem:[%s1698_s4 + $0x10] sm:$0xff] }
   0xb   :  { %v36_v30 = vld [vmem:[%s1697_s1 + $0x40] sm:$0xff]  ;;  %v528_v32 = vld [vmem:[%s1698_s4 + $0x18] sm:$0xff]  ;;  %v37_v33 = vld [vmem:[%s1697_s1 + $0x48] sm:$0xff] }
   0xc   :  { %1012 = vmatmul.msk.f32.gmra.mxu0 %vm144_vm0, %v29_v10  ;;  %v770_v34 = vld [vmem:[%s1699_s5 + $0x8] sm:$0xff]  ;;  %v529_v35 = vld [vmem:[%s1698_s4 + $0x20] sm:$0xff]  ;;  %v38_v36 = vld [vmem:[%s1697_s1 + $0x50] sm:$0xff] }
   0xd   :  { %1028 = vmatmul.msk.f32.gmra.mxu1 %vm144_vm0, %v29_v10  ;;  %1044 = vmatmul.msk.f32.gmra.mxu2 %vm144_vm0, %v29_v10  ;;  %v530_v37 = vld [vmem:[%s1698_s4 + $0x28] sm:$0xff]  ;;  %v772_v38 = vld [vmem:[%s1699_s5 + $0x18] sm:$0xff]  ;;  %v773_v41 = vld [vmem:[%s1699_s5 + $0x20] sm:$0xff] }
   0xe   :  { %1060 = vmatmul.msk.f32.gmra.mxu3 %vm144_vm0, %v29_v10  ;;  %126 = vperm.xlu1 %1077, %v60_v11   ;;  %v39_v39 = vld [vmem:[%s1697_s1 + $0x58] sm:$0xff]  ;;  %v526_v40 = vld [vmem:[%s1698_s4 + $0x8] sm:$0xff]  ;;  %v40_v43 = vld [vmem:[%s1697_s1 + $0x60] sm:$0xff] }
   0xf   :  { %v532_v42 = vld [vmem:[%s1698_s4 + $0x38] sm:$0xff]  ;;  %v769_v44 = vld [vmem:[%s1699_s5] sm:$0xff]  ;;  %v775_v45 = vld [vmem:[%s1699_s5 + $0x30] sm:$0xff] }
  0x10   :  { %116 = vperm.xlu2 %1078, %v58_v12   ;;  %v776_v46 = vld [vmem:[%s1699_s5 + $0x38] sm:$0xff]  ;;  %v41_v47 = vld [vmem:[%s1697_s1 + $0x68] sm:$0xff]  ;;  %v771_v48 = vld [vmem:[%s1699_s5 + $0x10] sm:$0xff] }
  0x11   :  { %v42_v49 = vld [vmem:[%s1697_s1 + $0x70] sm:$0xff]  ;;  %v43_v51 = vld [vmem:[%s1697_s1 + $0x78] sm:$0xff]  ;;  %v774_v52 = vld [vmem:[%s1699_s5 + $0x28] sm:$0xff] }
  0x12   :  { %111 = vperm.xlu0 %1076, %v57_v13   ;;  %v531_v50 = vld [vmem:[%s1698_s4 + $0x30] sm:$0xff]  ;;  %v901_v56 = vld [vmem:[#allocation2] sm:$0x1] }
  0x14   :  { %1013 = vmatmul.msk.f32.gmra.mxu0 %vm144_vm0, %v30_v14 }
  0x15   :  { %1029 = vmatmul.msk.f32.gmra.mxu1 %vm144_vm0, %v30_v14  ;;  %1045 = vmatmul.msk.f32.gmra.mxu2 %vm144_vm0, %v30_v14 }
  0x16   :  { %1061 = vmatmul.msk.f32.gmra.mxu3 %vm144_vm0, %v30_v14  ;;  %106 = vperm.xlu1 %1077, %v56_v15  }
  0x18   :  { %101 = vperm.xlu2 %1078, %v55_v16  }
  0x1a   :  { %96 = vperm.xlu0 %1076, %v54_v17  }
  0x1c   :  { %1014 = vmatmul.msk.f32.gmra.mxu0 %vm144_vm0, %v31_v18 }
  0x1d   :  { %1030 = vmatmul.msk.f32.gmra.mxu1 %vm144_vm0, %v31_v18  ;;  %1046 = vmatmul.msk.f32.gmra.mxu2 %vm144_vm0, %v31_v18 }
  0x1e   :  { %1062 = vmatmul.msk.f32.gmra.mxu3 %vm144_vm0, %v31_v18  ;;  %91 = vperm.xlu1 %1077, %v53_v19  }
  0x20   :  { %86 = vperm.xlu2 %1078, %v52_v20  }
  0x22   :  { %81 = vperm.xlu0 %1076, %v51_v21  }
  0x24   :  { %1015 = vmatmul.msk.f32.gmra.mxu0 %vm144_vm0, %v32_v22 }
  0x25   :  { %1031 = vmatmul.msk.f32.gmra.mxu1 %vm144_vm0, %v32_v22  ;;  %1047 = vmatmul.msk.f32.gmra.mxu2 %vm144_vm0, %v32_v22 }
  0x26   :  { %1063 = vmatmul.msk.f32.gmra.mxu3 %vm144_vm0, %v32_v22  ;;  %76 = vperm.xlu1 %1077, %v50_v23  }
  0x28   :  { %71 = vperm.xlu2 %1078, %v49_v24  }
  0x2a   :  { %66 = vperm.xlu0 %1076, %v48_v25  }
  0x2c   :  { %1016 = vmatmul.msk.f32.gmra.mxu0 %vm144_vm0, %v33_v26 }
  0x2d   :  { %1032 = vmatmul.msk.f32.gmra.mxu1 %vm144_vm0, %v33_v26  ;;  %1048 = vmatmul.msk.f32.gmra.mxu2 %vm144_vm0, %v33_v26 }
  0x2e   :  { %1064 = vmatmul.msk.f32.gmra.mxu3 %vm144_vm0, %v33_v26  ;;  %535 = vperm.xlu1 %1077, %v525_v29  }
  0x30   :  { %540 = vperm.xlu2 %1078, %v526_v40  }
  0x32   :  { %545 = vperm.xlu0 %1076, %v527_v31  }
  0x34   :  { %1017 = vmatmul.msk.f32.gmra.mxu0 %vm144_vm0, %v34_v27 }
  0x35   :  { %1033 = vmatmul.msk.f32.gmra.mxu1 %vm144_vm0, %v34_v27  ;;  %1049 = vmatmul.msk.f32.gmra.mxu2 %vm144_vm0, %v34_v27 }
  0x36   :  { %1065 = vmatmul.msk.f32.gmra.mxu3 %vm144_vm0, %v34_v27  ;;  %550 = vperm.xlu1 %1077, %v528_v32  }
  0x38   :  { %779 = vperm.xlu2 %1078, %v769_v44  }
  0x3a   :  { %784 = vperm.xlu0 %1076, %v770_v34  }
  0x3c   :  { %1018 = vmatmul.msk.f32.gmra.mxu0 %vm144_vm0, %v35_v28 }
  0x3d   :  { %1034 = vmatmul.msk.f32.gmra.mxu1 %vm144_vm0, %v35_v28  ;;  %1050 = vmatmul.msk.f32.gmra.mxu2 %vm144_vm0, %v35_v28 }
  0x3e   :  { %1066 = vmatmul.msk.f32.gmra.mxu3 %vm144_vm0, %v35_v28  ;;  %555 = vperm.xlu1 %1077, %v529_v35  }
  0x40   :  { %789 = vperm.xlu2 %1078, %v771_v48  }
  0x42   :  { %560 = vperm.xlu0 %1076, %v530_v37  }
  0x44   :  { %1019 = vmatmul.msk.f32.gmra.mxu0 %vm144_vm0, %v36_v30 }
  0x45   :  { %1035 = vmatmul.msk.f32.gmra.mxu1 %vm144_vm0, %v36_v30  ;;  %1051 = vmatmul.msk.f32.gmra.mxu2 %vm144_vm0, %v36_v30 }
  0x46   :  { %1067 = vmatmul.msk.f32.gmra.mxu3 %vm144_vm0, %v36_v30  ;;  %794 = vperm.xlu1 %1077, %v772_v38  }
  0x48   :  { %565 = vperm.xlu2 %1078, %v531_v50  }
  0x4a   :  { %799 = vperm.xlu0 %1076, %v773_v41  }
  0x4c   :  { %1020 = vmatmul.msk.f32.gmra.mxu0 %vm144_vm0, %v37_v33 }
  0x4d   :  { %1036 = vmatmul.msk.f32.gmra.mxu1 %vm144_vm0, %v37_v33  ;;  %1052 = vmatmul.msk.f32.gmra.mxu2 %vm144_vm0, %v37_v33 }
  0x4e   :  { %1068 = vmatmul.msk.f32.gmra.mxu3 %vm144_vm0, %v37_v33  ;;  %570 = vperm.xlu1 %1077, %v532_v42  }
  0x50   :  { %804 = vperm.xlu2 %1078, %v774_v52  }
  0x52   :  { %809 = vperm.xlu0 %1076, %v775_v45  }
  0x54   :  { %1021 = vmatmul.msk.f32.gmra.mxu0 %vm144_vm0, %v38_v36 }
  0x55   :  { %1037 = vmatmul.msk.f32.gmra.mxu1 %vm144_vm0, %v38_v36  ;;  %1053 = vmatmul.msk.f32.gmra.mxu2 %vm144_vm0, %v38_v36 }
  0x56   :  { %1069 = vmatmul.msk.f32.gmra.mxu3 %vm144_vm0, %v38_v36  ;;  %814 = vperm.xlu1 %1077, %v776_v46  }
  0x58   :  { %904 = vperm.xlu2 %1078, %v901_v56  }
  0x5c   :  { %1022 = vmatmul.msk.f32.gmra.mxu0 %vm144_vm0, %v39_v39 }
  0x5d   :  { %1038 = vmatmul.msk.f32.gmra.mxu1 %vm144_vm0, %v39_v39  ;;  %1054 = vmatmul.msk.f32.gmra.mxu2 %vm144_vm0, %v39_v39 }
  0x5e   :  { %1070 = vmatmul.msk.f32.gmra.mxu3 %vm144_vm0, %v39_v39 }
  0x64   :  { %1023 = vmatmul.msk.f32.gmra.mxu0 %vm144_vm0, %v40_v43 }
  0x65   :  { %1039 = vmatmul.msk.f32.gmra.mxu1 %vm144_vm0, %v40_v43  ;;  %1055 = vmatmul.msk.f32.gmra.mxu2 %vm144_vm0, %v40_v43 }
  0x66   :  { %1071 = vmatmul.msk.f32.gmra.mxu3 %vm144_vm0, %v40_v43 }
  0x6c   :  { %1024 = vmatmul.msk.f32.gmra.mxu0 %vm144_vm0, %v41_v47 }
  0x6d   :  { %1040 = vmatmul.msk.f32.gmra.mxu1 %vm144_vm0, %v41_v47  ;;  %1056 = vmatmul.msk.f32.gmra.mxu2 %vm144_vm0, %v41_v47 }
  0x6e   :  { %1072 = vmatmul.msk.f32.gmra.mxu3 %vm144_vm0, %v41_v47  ;;  %v1449_v47 = vpop.permute.xlu2 %121 }
  0x74   :  { %1025 = vmatmul.msk.f32.gmra.mxu0 %vm144_vm0, %v42_v49  ;;  %v142_v37 = vpop.permute.xlu0 %141 }
  0x75   :  { %1041 = vmatmul.msk.f32.gmra.mxu1 %vm144_vm0, %v42_v49  ;;  %1057 = vmatmul.msk.f32.gmra.mxu2 %vm144_vm0, %v42_v49 }
  0x76   :  { %1073 = vmatmul.msk.f32.gmra.mxu3 %vm144_vm0, %v42_v49  ;;  %v1451_v56 = vpop.permute.xlu2 %116 }
  0x78   :  { %v132_v42 = vpop.permute.xlu1 %131 }
  0x7c   :  { %1026 = vmatmul.msk.f32.gmra.mxu0 %vm144_vm0, %v43_v51  ;;  %v137_v48 = vpop.permute.xlu0 %136 }
  0x7d   :  { %1042 = vmatmul.msk.f32.gmra.mxu1 %vm144_vm0, %v43_v51  ;;  %1058 = vmatmul.msk.f32.gmra.mxu2 %vm144_vm0, %v43_v51 }
  0x7e   :  { %1074 = vmatmul.msk.f32.gmra.mxu3 %vm144_vm0, %v43_v51  ;;  %vm995_vm0 = vcmask 1040384  }
  0x80   :  { %v127_v53 = vpop.permute.xlu1 %126 }
  0x81   :  { %v1359_v54 = vpop.f32.mrf.mxu0 }
  0x82   :  { %1703 = vst [vmem:[#allocation3_spill] sm:$0xff] %v1359_v54  ;;  %v1361_v55 = vpop.f32.mrf.mxu1 }
  0x83   :  { %1704 = vst [vmem:[#allocation4_spill] sm:$0xff] %v1361_v55 }
  0x88   :  { %v1363_v57 = vpop.f32.mrf.mxu2 }
  0x89   :  { %1705 = vst [vmem:[#allocation5_spill] sm:$0xff] %v1363_v57  ;;  %v1365_v58 = vpop.f32.mrf.mxu3  ;;  %v1367_v59 = vpop.f32.mrf.mxu0 }
  0x8a   :  { %1706 = vst [vmem:[#allocation6_spill] sm:$0xff] %v1365_v58  ;;  %v1369_v60 = vpop.f32.mrf.mxu1  ;;  %v1453_v58 = vpop.permute.xlu0 %111 }
  0x8b   :  { %1707 = vst [vmem:[#allocation7_spill] sm:$0xff] %v1367_v59 }
  0x8c   :  { %1708 = vst [vmem:[#allocation8_spill] sm:$0xff] %v1369_v60  ;;  %v1455_v60 = vpop.permute.xlu1 %106 }
  0x90   :  { %v1371_v61 = vpop.f32.mrf.mxu2 }
  0x91   :  { %1709 = vst [vmem:[#allocation9_spill] sm:$0xff] %v1371_v61  ;;  %v1373_v62 = vpop.f32.mrf.mxu3  ;;  %v1375_v63 = vpop.f32.mrf.mxu0 }
  0x92   :  { %1710 = vst [vmem:[#allocation10_spill] sm:$0xff] %v1373_v62  ;;  %v1377_v0 = vpop.f32.mrf.mxu1 }
  0x93   :  { %1711 = vst [vmem:[#allocation11_spill] sm:$0xff] %v1375_v63  ;;  %v1459_v63 = vpop.permute.xlu0 %96 }
  0x94   :  { %1712 = vst [vmem:[#allocation12_spill] sm:$0xff] %v1377_v0 }
  0x98   :  { %v1379_v1 = vpop.f32.mrf.mxu2 }
  0x99   :  { %1713 = vst [vmem:[#allocation13_spill] sm:$0xff] %v1379_v1  ;;  %v1381_v2 = vpop.f32.mrf.mxu3  ;;  %v1383_v3 = vpop.f32.mrf.mxu0 }
  0x9a   :  { %1714 = vst [vmem:[#allocation14_spill] sm:$0xff] %v1381_v2  ;;  %v1385_v4 = vpop.f32.mrf.mxu1 }
  0x9b   :  { %1715 = vst [vmem:[#allocation15_spill] sm:$0xff] %v1385_v4 }
  0xa0   :  { %v1387_v5 = vpop.f32.mrf.mxu2 }
  0xa1   :  { %1716 = vst [vmem:[#allocation16_spill] sm:$0xff] %v1387_v5  ;;  %v1389_v6 = vpop.f32.mrf.mxu3  ;;  %v1391_v7 = vpop.f32.mrf.mxu0 }
  0xa2   :  { %1717 = vst [vmem:[#allocation17_spill] sm:$0xff] %v1389_v6  ;;  %v1393_v8 = vpop.f32.mrf.mxu1 }
  0xa8   :  { %v1395_v9 = vpop.f32.mrf.mxu2 }
  0xa9   :  { %1718 = vst [vmem:[#allocation18_spill] sm:$0xff] %v1395_v9  ;;  %v1397_v10 = vpop.f32.mrf.mxu3  ;;  %v1399_v11 = vpop.f32.mrf.mxu0 }
  0xaa   :  { %1719 = vst [vmem:[#allocation19_spill] sm:$0xff] %v1397_v10  ;;  %v1401_v12 = vpop.f32.mrf.mxu1 }
  0xb0   :  { %v1403_v13 = vpop.f32.mrf.mxu2 }
  0xb1   :  { %1720 = vst [vmem:[#allocation20_spill] sm:$0xff] %v1403_v13  ;;  %v1405_v14 = vpop.f32.mrf.mxu3  ;;  %v1407_v15 = vpop.f32.mrf.mxu0 }
  0xb2   :  { %1721 = vst [vmem:[#allocation21_spill] sm:$0xff] %v1405_v14  ;;  %v1409_v16 = vpop.f32.mrf.mxu1  ;;  %v1457_v13 = vpop.permute.xlu2 %101 }
  0xb8   :  { %v1411_v17 = vpop.f32.mrf.mxu2 }
  0xb9   :  { %1722 = vst [vmem:[#allocation22_spill] sm:$0xff] %v1411_v17  ;;  %v1413_v18 = vpop.f32.mrf.mxu3  ;;  %v1415_v19 = vpop.f32.mrf.mxu0 }
  0xba   :  { %1723 = vst [vmem:[#allocation23_spill] sm:$0xff] %v1413_v18  ;;  %v1417_v20 = vpop.f32.mrf.mxu1 }
  0xc0   :  { %v1419_v21 = vpop.f32.mrf.mxu2 }
  0xc1   :  { %v1421_v22 = vpop.f32.mrf.mxu3  ;;  %v1423_v23 = vpop.f32.mrf.mxu0 }
  0xc2   :  { %v1425_v24 = vpop.f32.mrf.mxu1 }
  0xc8   :  { %v1427_v25 = vpop.f32.mrf.mxu2 }
  0xc9   :  { %v1429_v26 = vpop.f32.mrf.mxu3  ;;  %v1431_v27 = vpop.f32.mrf.mxu0 }
  0xca   :  { %v1433_v28 = vpop.f32.mrf.mxu1 }
  0xd0   :  { %v1435_v29 = vpop.f32.mrf.mxu2 }
  0xd1   :  { %v1437_v30 = vpop.f32.mrf.mxu3  ;;  %v240_v31 = vpop.f32.mrf.mxu0 }
  0xd2   :  { %v305_v32 = vpop.f32.mrf.mxu1 }
  0xd8   :  { %v1439_v33 = vpop.f32.mrf.mxu2 }
  0xd9   :  { %v1441_v34 = vpop.f32.mrf.mxu3  ;;  %v243_v35 = vpop.f32.mrf.mxu0 }
  0xda   :  { %v308_v36 = vpop.f32.mrf.mxu1 }
  0xe0   :  { %v1443_v38 = vpop.f32.mrf.mxu2 }
  0xe1   :  { %v1445_v39 = vpop.f32.mrf.mxu3  ;;  %v246_v40 = vpop.f32.mrf.mxu0 }
  0xe2   :  { %v311_v41 = vpop.f32.mrf.mxu1  ;;  %v247_v14 = vadd.f32 %v246_v40, %v127_v53 }
  0xe3   :  { %v312_v18 = vadd.f32 %v311_v41, %v127_v53 }
  0xe8   :  { %v376_v43 = vpop.f32.mrf.mxu2 }
  0xe9   :  { %v1447_v44 = vpop.f32.mrf.mxu3  ;;  %v249_v45 = vpop.f32.mrf.mxu0 }
  0xea   :  { %v314_v46 = vpop.f32.mrf.mxu1  ;;  %v250_v54 = vadd.f32 %v249_v45, %v132_v42 }
  0xeb   :  { %v315_v9 = vadd.f32 %v314_v46, %v132_v42 }
  0xed   :  { %v506_v45 = vmax.f32 %v315_v9, 0.0 }
  0xf0   :  { %v379_v49 = vpop.f32.mrf.mxu2 }
  0xf1   :  { %v444_v50 = vpop.f32.mrf.mxu3  ;;  %v252_v51 = vpop.f32.mrf.mxu0 }
  0xf2   :  { %v317_v52 = vpop.f32.mrf.mxu1  ;;  %v253_v2 = vadd.f32 %v252_v51, %v137_v48  ;;  %v505_v51 = vmax.f32 %v250_v54, 0.0 }
  0xf3   :  { %v318_v55 = vadd.f32 %v317_v52, %v137_v48 }
  0xf4   :  { %v509_v0 = vmax.f32 %v253_v2, 0.0  ;;  %v241_v2 = vadd.f32 %v240_v31, %v1451_v56 }
  0xf5   :  { %v510_v17 = vmax.f32 %v318_v55, 0.0  ;;  %v306_v55 = vadd.f32 %v305_v32, %v1451_v56 }
  0xf6   :  { %v493_v32 = vmax.f32 %v241_v2, 0.0 }
  0xf8   :  { %v382_v57 = vpop.f32.mrf.mxu2 }
  0xf9   :  { %v447_v62 = vpop.f32.mrf.mxu3  ;;  %v255_v61 = vpop.f32.mrf.mxu0  ;;  %v383_v46 = vadd.f32 %v382_v57, %v137_v48  ;;  %v445_v57 = vadd.f32 %v444_v50, %v132_v42 }
  0xfa   :  { %v256_v1 = vadd.f32 %v255_v61, %v142_v37  ;;  %v320_v6 = vpop.f32.mrf.mxu1  ;;  %v244_v61 = vadd.f32 %v243_v35, %v1449_v47  ;;  %v448_v52 = vadd.f32 %v447_v62, %v137_v48  ;;  %v380_v35 = vadd.f32 %v379_v49, %v132_v42  ;;  %v1482_v50 = vpop.permute.xlu2 %86 }
  0xfb   :  { %v321_v5 = vadd.f32 %v320_v6, %v142_v37  ;;  %v377_v62 = vadd.f32 %v376_v43, %v127_v53  ;;  %v511_v31 = vmax.f32 %v383_v46, 0.0  ;;  %v374_v42 = vadd.f32 %v1443_v38, %v1449_v47 }
  0xfc   :  { %v513_v10 = vmax.f32 %v256_v1, 0.0  ;;  %v309_v1 = vadd.f32 %v308_v36, %v1449_v47  ;;  %v497_v9 = vmax.f32 %v244_v61, 0.0  ;;  %v512_v41 = vmax.f32 %v448_v52, 0.0 }
  0xfd   :  { %v514_v59 = vmax.f32 %v321_v5, 0.0  ;;  %v507_v43 = vmax.f32 %v380_v35, 0.0  ;;  %v508_v49 = vmax.f32 %v445_v57, 0.0  ;;  %v297_v38 = vadd.f32 %v1417_v20, %v1457_v13 }
  0xfe   :  { %573 = vmatpush.msrb.mxu0 %v513_v10  ;;  %v501_v10 = vmax.f32 %v247_v14, 0.0  ;;  %v498_v14 = vmax.f32 %v309_v1, 0.0  ;;  %v371_v61 = vadd.f32 %v1439_v33, %v1451_v56  ;;  %v294_v20 = vadd.f32 %v1409_v16, %v1459_v63 }
  0xff   :  { %614 = vmatpush.msrb.mxu1 %v514_v59  ;;  %v502_v59 = vmax.f32 %v312_v18, 0.0  ;;  %v235_v18 = vadd.f32 %v1423_v23, %v1455_v60  ;;  %v232_v23 = vadd.f32 %v1415_v19, %v1457_v13  ;;  %v229_v19 = vadd.f32 %v1407_v15, %v1459_v63 }
 0x100   :  { %v385_v6 = vpop.f32.mrf.mxu2  ;;  %574 = vmatpush.msrb.mxu0 %v509_v0  ;;  %v238_v0 = vadd.f32 %v1431_v27, %v1453_v58  ;;  %v1472_v27 = vpop.permute.xlu1 %91  ;;  %v368_v33 = vadd.f32 %v1435_v29, %v1453_v58  ;;  %v365_v29 = vadd.f32 %v1427_v25, %v1455_v60  ;;  %v362_v25 = vadd.f32 %v1419_v21, %v1457_v13  ;;  %v1725_v21 = vld [vmem:[#allocation22_spill] sm:$0xff] }
 0x101   :  { %v386_v5 = vadd.f32 %v385_v6, %v142_v37  ;;  %v450_v40 = vpop.f32.mrf.mxu3  ;;  %615 = vmatpush.msrb.mxu1 %v510_v17  ;;  %v303_v17 = vadd.f32 %v1433_v28, %v1453_v58  ;;  %v494_v28 = vmax.f32 %v306_v55, 0.0  ;;  %v226_v15 = vadd.f32 %v1399_v11, %v1472_v27 }
 0x102   :  { %v451_v4 = vadd.f32 %v450_v40, %v142_v37  ;;  %575 = vmatpush.msrb.mxu0 %v505_v51  ;;  %v442_v37 = vadd.f32 %v1447_v44, %v127_v53  ;;  %v489_v48 = vmax.f32 %v238_v0, 0.0  ;;  %v439_v44 = vadd.f32 %v1445_v39, %v1449_v47 }
 0x103   :  { %v515_v54 = vmax.f32 %v386_v5, 0.0  ;;  %616 = vmatpush.msrb.mxu1 %v506_v45  ;;  %v490_v53 = vmax.f32 %v303_v17, 0.0  ;;  %v503_v51 = vmax.f32 %v377_v62, 0.0  ;;  %v485_v39 = vmax.f32 %v235_v18, 0.0  ;;  %v1728_v18 = vld [vmem:[#allocation20_spill] sm:$0xff] }
 0x104   :  { %v516_v36 = vmax.f32 %v451_v4, 0.0  ;;  %576 = vmatpush.msrb.mxu0 %v501_v10  ;;  %v300_v4 = vadd.f32 %v1425_v24, %v1455_v60  ;;  %v1484_v24 = vpop.permute.xlu0 %81  ;;  %v436_v47 = vadd.f32 %v1441_v34, %v1451_v56  ;;  %v504_v6 = vmax.f32 %v442_v37, 0.0 }
 0x105   :  { %617 = vmatpush.msrb.mxu1 %v502_v59  ;;  %655 = vmatpush.msrb.mxu2 %v515_v54  ;;  %v499_v45 = vmax.f32 %v374_v42, 0.0  ;;  %v481_v46 = vmax.f32 %v232_v23, 0.0  ;;  %v433_v34 = vadd.f32 %v1437_v30, %v1453_v58  ;;  %v500_v56 = vmax.f32 %v439_v44, 0.0  ;;  %v1731_v23 = vld [vmem:[#allocation7_spill] sm:$0xff] }
 0x106   :  { %696 = vmatpush.msrb.mxu3 %v516_v36  ;;  %577 = vmatpush.msrb.mxu0 %v497_v9  ;;  %v486_v1 = vmax.f32 %v300_v4, 0.0  ;;  %v291_v16 = vadd.f32 %v1401_v12, %v1472_v27  ;;  %v482_v5 = vmax.f32 %v297_v38, 0.0  ;;  %v495_v40 = vmax.f32 %v371_v61, 0.0  ;;  %v1733_v61 = vld [vmem:[#allocation8_spill] sm:$0xff] }
 0x107   :  { %618 = vmatpush.msrb.mxu1 %v498_v14  ;;  %656 = vmatpush.msrb.mxu2 %v511_v31  ;;  %v223_v11 = vadd.f32 %v1391_v7, %v1482_v50  ;;  %v477_v2 = vmax.f32 %v229_v19, 0.0  ;;  %v430_v58 = vadd.f32 %v1429_v26, %v1455_v60  ;;  %v496_v30 = vmax.f32 %v436_v47, 0.0  ;;  %v72_v14 = vpop.permute.xlu2 %71  ;;  %v1734_v19 = vld [vmem:[#allocation19_spill] sm:$0xff] }
 0x108   :  { %697 = vmatpush.msrb.mxu3 %v512_v41  ;;  %578 = vmatpush.msrb.mxu0 %v493_v32  ;;  %v288_v12 = vadd.f32 %v1393_v8, %v1482_v50  ;;  %v478_v10 = vmax.f32 %v294_v20, 0.0  ;;  %v491_v52 = vmax.f32 %v368_v33, 0.0  ;;  %v220_v7 = vadd.f32 %v1383_v3, %v1484_v24  ;;  %v77_v59 = vpop.permute.xlu1 %76  ;;  %v1724_v8 = vld [vmem:[#allocation15_spill] sm:$0xff]  ;;  %v1729_v41 = vld [vmem:[#allocation12_spill] sm:$0xff] }
 0x109   :  { %619 = vmatpush.msrb.mxu1 %v494_v28  ;;  %657 = vmatpush.msrb.mxu2 %v507_v43  ;;  %v473_v55 = vmax.f32 %v226_v15, 0.0  ;;  %v427_v60 = vadd.f32 %v1421_v22, %v1457_v13  ;;  %v492_v26 = vmax.f32 %v433_v34, 0.0  ;;  %v285_v35 = vadd.f32 %v1724_v8, %v1484_v24  ;;  %v1726_v3 = vld [vmem:[#allocation23_spill] sm:$0xff] }
 0x10a   :  { %698 = vmatpush.msrb.mxu3 %v508_v49  ;;  %579 = vmatpush.msrb.mxu0 %v489_v48  ;;  %v474_v54 = vmax.f32 %v291_v16, 0.0  ;;  %v359_v0 = vadd.f32 %v1725_v21, %v1459_v63  ;;  %v487_v9 = vmax.f32 %v365_v29, 0.0  ;;  %v469_v57 = vmax.f32 %v223_v11, 0.0  ;;  %v1727_v13 = vld [vmem:[#allocation11_spill] sm:$0xff]  ;;  %v1732_v49 = vld [vmem:[#allocation18_spill] sm:$0xff]  ;;  %v1739_v29 = vld [vmem:[#allocation13_spill] sm:$0xff] }
 0x10b   :  { %620 = vmatpush.msrb.mxu1 %v490_v53  ;;  %658 = vmatpush.msrb.mxu2 %v503_v51  ;;  %v424_v36 = vadd.f32 %v1726_v3, %v1459_v63  ;;  %v488_v17 = vmax.f32 %v430_v58, 0.0  ;;  %v217_v22 = vadd.f32 %v1727_v13, %v77_v59  ;;  %v470_v31 = vmax.f32 %v288_v12, 0.0  ;;  %v1730_v63 = vld [vmem:[#allocation21_spill] sm:$0xff]  ;;  %v1740_v58 = vld [vmem:[#allocation14_spill] sm:$0xff]  ;;  %v518_v13 = vld [vmem:[%s1701_s3 + $0x8] sm:$0xff] }
 0x10c   :  { %699 = vmatpush.msrb.mxu3 %v504_v6  ;;  %580 = vmatpush.msrb.mxu0 %v485_v39  ;;  %v1525_v62 = vpop.permute.xlu0 %66  ;;  %v356_v32 = vadd.f32 %v1728_v18, %v1472_v27  ;;  %v483_v37 = vmax.f32 %v362_v25, 0.0  ;;  %v282_v4 = vadd.f32 %v1729_v41, %v77_v59  ;;  %v465_v28 = vmax.f32 %v220_v7, 0.0  ;;  %v1735_v6 = vld [vmem:[#allocation3_spill] sm:$0xff]  ;;  %v1741_v25 = vld [vmem:[#allocation9_spill] sm:$0xff] }
 0x10d   :  { %621 = vmatpush.msrb.mxu1 %v486_v1  ;;  %659 = vmatpush.msrb.mxu2 %v499_v45  ;;  %v421_v42 = vadd.f32 %v1730_v63, %v1472_v27  ;;  %v484_v43 = vmax.f32 %v427_v60, 0.0  ;;  %v214_v48 = vadd.f32 %v1731_v23, %v72_v14  ;;  %v466_v44 = vmax.f32 %v285_v35, 0.0  ;;  %v1736_v1 = vld [vmem:[#allocation16_spill] sm:$0xff]  ;;  %v1742_v60 = vld [vmem:[#allocation10_spill] sm:$0xff]  ;;  %v1743_v35 = vld [vmem:[#allocation5_spill] sm:$0xff] }
 0x10e   :  { %700 = vmatpush.msrb.mxu3 %v500_v56  ;;  %581 = vmatpush.msrb.mxu0 %v481_v46  ;;  %v353_v38 = vadd.f32 %v1732_v49, %v1482_v50  ;;  %v479_v53 = vmax.f32 %v359_v0, 0.0  ;;  %v279_v51 = vadd.f32 %v1733_v61, %v72_v14  ;;  %v418_v39 = vadd.f32 %v1734_v19, %v1482_v50  ;;  %v1737_v46 = vld [vmem:[#allocation4_spill] sm:$0xff]  ;;  %v1738_v56 = vld [vmem:[#allocation17_spill] sm:$0xff]  ;;  %v1744_v0 = vld [vmem:[#allocation6_spill] sm:$0xff] }
 0x10f   :  { %622 = vmatpush.msrb.mxu1 %v482_v5  ;;  %660 = vmatpush.msrb.mxu2 %v495_v40  ;;  %v480_v47 = vmax.f32 %v424_v36, 0.0  ;;  %v461_v27 = vmax.f32 %v217_v22, 0.0  ;;  %v211_v20 = vadd.f32 %v1735_v6, %v1525_v62  ;;  %v350_v33 = vadd.f32 %v1736_v1, %v1484_v24  ;;  %v519_v22 = vld [vmem:[%s1701_s3 + $0x10] sm:$0xff]  ;;  %v541_v23 = vpop.permute.xlu2 %540 }
 0x110   :  { %701 = vmatpush.msrb.mxu3 %v496_v30  ;;  %582 = vmatpush.msrb.mxu0 %v477_v2  ;;  %v475_v45 = vmax.f32 %v356_v32, 0.0  ;;  %v462_v15 = vmax.f32 %v282_v4, 0.0  ;;  %v276_v34 = vadd.f32 %v1737_v46, %v1525_v62  ;;  %v415_v50 = vadd.f32 %v1738_v56, %v1484_v24  ;;  %v523_v18 = vld [vmem:[%s1701_s3 + $0x30] sm:$0xff]  ;;  %v524_v32 = vld [vmem:[%s1701_s3 + $0x38] sm:$0xff]  ;;  %v536_v63 = vpop.permute.xlu1 %535 }
 0x111   :  { %623 = vmatpush.msrb.mxu1 %v478_v10  ;;  %661 = vmatpush.msrb.mxu2 %v491_v52  ;;  %v476_v16 = vmax.f32 %v421_v42, 0.0  ;;  %v457_v5 = vmax.f32 %v214_v48, 0.0  ;;  %v347_v40 = vadd.f32 %v1739_v29, %v77_v59  ;;  %v471_v11 = vmax.f32 %v353_v38, 0.0 }
 0x112   :  { %702 = vmatpush.msrb.mxu3 %v492_v26  ;;  %583 = vmatpush.msrb.mxu0 %v473_v55  ;;  %v458_v2 = vmax.f32 %v279_v51, 0.0  ;;  %v412_v30 = vadd.f32 %v1740_v58, %v77_v59  ;;  %v472_v12 = vmax.f32 %v418_v39, 0.0  ;;  %v453_v10 = vmax.f32 %v211_v20, 0.0  ;;  %v517_v55 = vld [vmem:[%s1701_s3] sm:$0xff] }
 0x113   :  { %624 = vmatpush.msrb.mxu1 %v474_v54  ;;  %662 = vmatpush.msrb.mxu2 %v487_v9  ;;  %v344_v52 = vadd.f32 %v1741_v25, %v72_v14  ;;  %v467_v7 = vmax.f32 %v350_v33, 0.0  ;;  %v454_v24 = vmax.f32 %v276_v34, 0.0  ;;  %v409_v26 = vadd.f32 %v1742_v60, %v72_v14  ;;  %v520_v14 = vld [vmem:[%s1701_s3 + $0x18] sm:$0xff] }
 0x114   :  { %703 = vmatpush.msrb.mxu3 %v488_v17  ;;  %584 = vmatpush.msrb.mxu0 %v469_v57  ;;  %v468_v8 = vmax.f32 %v415_v50, 0.0  ;;  %v463_v59 = vmax.f32 %v347_v40, 0.0  ;;  %v341_v54 = vadd.f32 %v1743_v35, %v1525_v62  ;;  %v464_v21 = vmax.f32 %v412_v30, 0.0  ;;  %v546_v48 = vpop.permute.xlu0 %545 }
 0x115   :  { %625 = vmatpush.msrb.mxu1 %v470_v31  ;;  %663 = vmatpush.msrb.mxu2 %v483_v37  ;;  %v406_v9 = vadd.f32 %v1744_v0, %v1525_v62  ;;  %v459_v57 = vmax.f32 %v344_v52, 0.0  ;;  %v460_v3 = vmax.f32 %v409_v26, 0.0  ;;  %v521_v62 = vld [vmem:[%s1701_s3 + $0x20] sm:$0xff]  ;;  %v522_v31 = vld [vmem:[%s1701_s3 + $0x28] sm:$0xff] }
 0x116   :  { %704 = vmatpush.msrb.mxu3 %v484_v43  ;;  %585 = vmatpush.msrb.mxu0 %v465_v28  ;;  %v455_v36 = vmax.f32 %v341_v54, 0.0 }
 0x117   :  { %626 = vmatpush.msrb.mxu1 %v466_v44  ;;  %664 = vmatpush.msrb.mxu2 %v479_v53  ;;  %v456_v17 = vmax.f32 %v406_v9, 0.0  ;;  %v1580_v51 = vpop.permute.xlu2 %779 }
 0x118   :  { %705 = vmatpush.msrb.mxu3 %v480_v47  ;;  %586 = vmatpush.msrb.mxu0 %v461_v27  ;;  %v1578_v38 = vpop.permute.xlu1 %550 }
 0x119   :  { %627 = vmatpush.msrb.mxu1 %v462_v15  ;;  %665 = vmatpush.msrb.mxu2 %v475_v45 }
 0x11a   :  { %706 = vmatpush.msrb.mxu3 %v476_v16  ;;  %587 = vmatpush.msrb.mxu0 %v457_v5 }
 0x11b   :  { %628 = vmatpush.msrb.mxu1 %v458_v2  ;;  %666 = vmatpush.msrb.mxu2 %v471_v11 }
 0x11c   :  { %707 = vmatpush.msrb.mxu3 %v472_v12  ;;  %588 = vmatpush.msrb.mxu0 %v453_v10  ;;  %v1582_v47 = vpop.permute.xlu0 %784 }
 0x11d   :  { %629 = vmatpush.msrb.mxu1 %v454_v24  ;;  %667 = vmatpush.msrb.mxu2 %v467_v7 }
 0x11e   :  { %708 = vmatpush.msrb.mxu3 %v468_v8  ;;  %589 = vmatmul.f32.vlgmr.msrb.gmra.mxu0 %v517_v55 }
 0x11f   :  { %630 = vmatmul.f32.vlgmr.msrb.gmra.mxu1 %v517_v55  ;;  %668 = vmatpush.msrb.mxu2 %v463_v59  ;;  %v1586_v15 = vpop.permute.xlu2 %789 }
 0x120   :  { %709 = vmatpush.msrb.mxu3 %v464_v21  ;;  %v1584_v20 = vpop.permute.xlu1 %555 }
 0x121   :  { %669 = vmatpush.msrb.mxu2 %v459_v57 }
 0x122   :  { %710 = vmatpush.msrb.mxu3 %v460_v3 }
 0x123   :  { %670 = vmatpush.msrb.mxu2 %v455_v36 }
 0x124   :  { %711 = vmatpush.msrb.mxu3 %v456_v17  ;;  %671 = vmatmul.f32.vlgmr.msrb.gmra.mxu2 %v517_v55  ;;  %v1588_v56 = vpop.permute.xlu0 %560 }
 0x125   :  { %712 = vmatmul.f32.vlgmr.msrb.gmra.mxu3 %v517_v55 }
 0x126   :  { %592 = vmatmul.f32.gmra.mxu0 %v518_v13 }
 0x127   :  { %633 = vmatmul.f32.gmra.mxu1 %v518_v13  ;;  %v1601_v8 = vpop.permute.xlu2 %565 }
 0x128   :  { %v1594_v2 = vpop.permute.xlu1 %794 }
 0x12c   :  { %674 = vmatmul.f32.gmra.mxu2 %v518_v13  ;;  %v1605_v36 = vpop.permute.xlu0 %799 }
 0x12d   :  { %715 = vmatmul.f32.gmra.mxu3 %v518_v13 }
 0x12e   :  { %595 = vmatmul.f32.gmra.mxu0 %v519_v22 }
 0x12f   :  { %636 = vmatmul.f32.gmra.mxu1 %v519_v22 }
 0x134   :  { %677 = vmatmul.f32.gmra.mxu2 %v519_v22 }
 0x135   :  { %718 = vmatmul.f32.gmra.mxu3 %v519_v22 }
 0x136   :  { %598 = vmatmul.f32.gmra.mxu0 %v520_v14 }
 0x137   :  { %639 = vmatmul.f32.gmra.mxu1 %v520_v14 }
 0x13c   :  { %680 = vmatmul.f32.gmra.mxu2 %v520_v14 }
 0x13d   :  { %721 = vmatmul.f32.gmra.mxu3 %v520_v14 }
 0x13e   :  { %601 = vmatmul.f32.gmra.mxu0 %v521_v62 }
 0x13f   :  { %642 = vmatmul.f32.gmra.mxu1 %v521_v62 }
 0x144   :  { %683 = vmatmul.f32.gmra.mxu2 %v521_v62 }
 0x145   :  { %724 = vmatmul.f32.gmra.mxu3 %v521_v62 }
 0x146   :  { %604 = vmatmul.f32.gmra.mxu0 %v522_v31 }
 0x147   :  { %645 = vmatmul.f32.gmra.mxu1 %v522_v31 }
 0x14c   :  { %686 = vmatmul.f32.gmra.mxu2 %v522_v31 }
 0x14d   :  { %727 = vmatmul.f32.gmra.mxu3 %v522_v31 }
 0x14e   :  { %607 = vmatmul.f32.gmra.mxu0 %v523_v18 }
 0x14f   :  { %648 = vmatmul.f32.gmra.mxu1 %v523_v18 }
 0x154   :  { %689 = vmatmul.f32.gmra.mxu2 %v523_v18 }
 0x155   :  { %730 = vmatmul.f32.gmra.mxu3 %v523_v18 }
 0x156   :  { %610 = vmatmul.f32.gmra.mxu0 %v524_v32 }
 0x157   :  { %651 = vmatmul.f32.gmra.mxu1 %v524_v32 }
 0x15c   :  { %692 = vmatmul.f32.gmra.mxu2 %v524_v32 }
 0x15d   :  { %733 = vmatmul.f32.gmra.mxu3 %v524_v32 }
 0x19b   :  { %v590_v37 = vpop.f32.mrf.mxu0 }
 0x19c   :  { %v631_v41 = vpop.f32.mrf.mxu1  ;;  %v591_v46 = vadd.f32 %v590_v37, %v536_v63 }
 0x19d   :  { %v632_v50 = vadd.f32 %v631_v41, %v536_v63 }
 0x19e   :  { %v737_v40 = vmax.f32 %v591_v46, 0.0 }
 0x19f   :  { %v738_v58 = vmax.f32 %v632_v50, 0.0 }
 0x1a0   :  { %v817_v24 = vmul.f32 %v1580_v51, %v737_v40 }
 0x1a1   :  { %v818_v59 = vmul.f32 %v1580_v51, %v738_v58 }
 0x1a3   :  { %v593_v4 = vpop.f32.mrf.mxu0 }
 0x1a4   :  { %v634_v28 = vpop.f32.mrf.mxu1  ;;  %v594_v33 = vadd.f32 %v593_v4, %v541_v23 }
 0x1a5   :  { %v635_v34 = vadd.f32 %v634_v28, %v541_v23 }
 0x1a6   :  { %v741_v5 = vmax.f32 %v594_v33, 0.0 }
 0x1a7   :  { %v672_v42 = vpop.f32.mrf.mxu2  ;;  %v742_v11 = vmax.f32 %v635_v34, 0.0 }
 0x1a8   :  { %v713_v43 = vpop.f32.mrf.mxu3  ;;  %v821_v12 = vmul.f32 %v1582_v47, %v741_v5  ;;  %v673_v7 = vadd.f32 %v672_v42, %v536_v63 }
 0x1a9   :  { %v822_v55 = vmul.f32 %v1582_v47, %v742_v11  ;;  %v714_v35 = vadd.f32 %v713_v43, %v536_v63 }
 0x1aa   :  { %v849_v21 = vadd.f32 %v821_v12, %v817_v24  ;;  %v739_v17 = vmax.f32 %v673_v7, 0.0 }
 0x1ab   :  { %v596_v44 = vpop.f32.mrf.mxu0  ;;  %v862_v62 = vadd.f32 %v822_v55, %v818_v59  ;;  %v740_v37 = vmax.f32 %v714_v35, 0.0  ;;  %v1629_v59 = vpop.permute.xlu0 %809 }
 0x1ac   :  { %v637_v49 = vpop.f32.mrf.mxu1  ;;  %v597_v10 = vadd.f32 %v596_v44, %v546_v48 }
 0x1ad   :  { %v638_v25 = vadd.f32 %v637_v49, %v546_v48 }
 0x1ae   :  { %v745_v0 = vmax.f32 %v597_v10, 0.0  ;;  %v1621_v10 = vpop.permute.xlu2 %804 }
 0x1af   :  { %v675_v53 = vpop.f32.mrf.mxu2  ;;  %v746_v9 = vmax.f32 %v638_v25, 0.0 }
 0x1b0   :  { %v716_v61 = vpop.f32.mrf.mxu3  ;;  %v676_v13 = vadd.f32 %v675_v53, %v541_v23  ;;  %v825_v42 = vmul.f32 %v1586_v15, %v745_v0  ;;  %v1613_v53 = vpop.permute.xlu1 %570 }
 0x1b1   :  { %v717_v22 = vadd.f32 %v716_v61, %v541_v23  ;;  %v826_v43 = vmul.f32 %v1586_v15, %v746_v9 }
 0x1b2   :  { %v743_v61 = vmax.f32 %v676_v13, 0.0  ;;  %v850_v40 = vadd.f32 %v849_v21, %v825_v42 }
 0x1b3   :  { %v599_v19 = vpop.f32.mrf.mxu0  ;;  %v863_v11 = vadd.f32 %v862_v62, %v826_v43 }
 0x1b4   :  { %v640_v39 = vpop.f32.mrf.mxu1  ;;  %v600_v60 = vadd.f32 %v599_v19, %v1578_v38  ;;  %v744_v19 = vmax.f32 %v717_v22, 0.0  ;;  %v823_v25 = vmul.f32 %v1582_v47, %v743_v61 }
 0x1b5   :  { %v641_v26 = vadd.f32 %v640_v39, %v1578_v38 }
 0x1b6   :  { %v749_v31 = vmax.f32 %v600_v60, 0.0 }
 0x1b7   :  { %v678_v27 = vpop.f32.mrf.mxu2  ;;  %v750_v18 = vmax.f32 %v641_v26, 0.0 }
 0x1b8   :  { %v719_v6 = vpop.f32.mrf.mxu3  ;;  %v679_v41 = vadd.f32 %v678_v27, %v546_v48  ;;  %v829_v27 = vmul.f32 %v1594_v2, %v749_v31 }
 0x1b9   :  { %v720_v4 = vadd.f32 %v719_v6, %v546_v48  ;;  %v819_v48 = vmul.f32 %v1580_v51, %v739_v17  ;;  %v830_v6 = vmul.f32 %v1594_v2, %v750_v18 }
 0x1ba   :  { %v747_v46 = vmax.f32 %v679_v41, 0.0 }
 0x1bb   :  { %v602_v1 = vpop.f32.mrf.mxu0  ;;  %v748_v34 = vmax.f32 %v720_v4, 0.0  ;;  %v864_v55 = vadd.f32 %v863_v11, %v830_v6 }
 0x1bc   :  { %v643_v45 = vpop.f32.mrf.mxu1  ;;  %v603_v57 = vadd.f32 %v602_v1, %v1584_v20  ;;  %v827_v35 = vmul.f32 %v1586_v15, %v747_v46 }
 0x1bd   :  { %v644_v14 = vadd.f32 %v643_v45, %v1584_v20  ;;  %v820_v45 = vmul.f32 %v1580_v51, %v740_v37  ;;  %v851_v51 = vadd.f32 %v850_v40, %v829_v27  ;;  %v828_v21 = vmul.f32 %v1586_v15, %v748_v34  ;;  %v815_v37 = vpop.permute.xlu1 %814 }
 0x1be   :  { %v753_v44 = vmax.f32 %v603_v57, 0.0 }
 0x1bf   :  { %v1590_v16 = vpop.f32.mrf.mxu2  ;;  %v754_v39 = vmax.f32 %v644_v14, 0.0 }
 0x1c0   :  { %v1592_v29 = vpop.f32.mrf.mxu3  ;;  %v833_v58 = vmul.f32 %v1605_v36, %v753_v44  ;;  %v682_v60 = vadd.f32 %v1590_v16, %v1578_v38 }
 0x1c1   :  { %v834_v7 = vmul.f32 %v1605_v36, %v754_v39  ;;  %v723_v0 = vadd.f32 %v1592_v29, %v1578_v38  ;;  %v875_v39 = vadd.f32 %v823_v25, %v819_v48 }
 0x1c2   :  { %v852_v57 = vadd.f32 %v851_v51, %v833_v58  ;;  %v751_v18 = vmax.f32 %v682_v60, 0.0 }
 0x1c3   :  { %v605_v30 = vpop.f32.mrf.mxu0  ;;  %v865_v14 = vadd.f32 %v864_v55, %v834_v7  ;;  %v752_v41 = vmax.f32 %v723_v0, 0.0 }
 0x1c4   :  { %v646_v52 = vpop.f32.mrf.mxu1  ;;  %v606_v32 = vadd.f32 %v605_v30, %v1588_v56 }
 0x1c5   :  { %v647_v28 = vadd.f32 %v646_v52, %v1588_v56  ;;  %v824_v52 = vmul.f32 %v1582_v47, %v744_v19 }
 0x1c6   :  { %v757_v33 = vmax.f32 %v606_v32, 0.0 }
 0x1c7   :  { %v684_v54 = vpop.f32.mrf.mxu2  ;;  %v758_v50 = vmax.f32 %v647_v28, 0.0 }
 0x1c8   :  { %v725_v3 = vpop.f32.mrf.mxu3  ;;  %v837_v26 = vmul.f32 %v1621_v10, %v757_v33  ;;  %v685_v17 = vadd.f32 %v684_v54, %v1584_v20  ;;  %v888_v33 = vadd.f32 %v824_v52, %v820_v45 }
 0x1c9   :  { %v838_v47 = vmul.f32 %v1621_v10, %v758_v50  ;;  %v726_v62 = vadd.f32 %v725_v3, %v1584_v20  ;;  %v876_v50 = vadd.f32 %v875_v39, %v827_v35 }
 0x1ca   :  { %v853_v38 = vadd.f32 %v852_v57, %v837_v26  ;;  %v755_v42 = vmax.f32 %v685_v17, 0.0  ;;  %v889_v58 = vadd.f32 %v888_v33, %v828_v21 }
 0x1cb   :  { %v608_v63 = vpop.f32.mrf.mxu0  ;;  %v866_v54 = vadd.f32 %v865_v14, %v838_v47 }
 0x1cc   :  { %v609_v23 = vadd.f32 %v608_v63, %v1601_v8  ;;  %v649_v49 = vpop.f32.mrf.mxu1 }
 0x1cd   :  { %v650_v1 = vadd.f32 %v649_v49, %v1601_v8 }
 0x1ce   :  { %v761_v30 = vmax.f32 %v609_v23, 0.0  ;;  %v756_v23 = vmax.f32 %v726_v62, 0.0 }
 0x1cf   :  { %v687_v5 = vpop.f32.mrf.mxu2  ;;  %v762_v24 = vmax.f32 %v650_v1, 0.0  ;;  %v831_v1 = vmul.f32 %v1594_v2, %v751_v18 }
 0x1d0   :  { %v728_v12 = vpop.f32.mrf.mxu3  ;;  %v841_v13 = vmul.f32 %v1629_v59, %v761_v30  ;;  %v688_v29 = vadd.f32 %v687_v5, %v1588_v56  ;;  %v835_v5 = vmul.f32 %v1605_v36, %v755_v42  ;;  %v836_v30 = vmul.f32 %v1605_v36, %v756_v23 }
 0x1d1   :  { %v842_v31 = vmul.f32 %v1629_v59, %v762_v24  ;;  %v729_v4 = vadd.f32 %v728_v12, %v1588_v56  ;;  %v832_v56 = vmul.f32 %v1594_v2, %v752_v41  ;;  %v877_v48 = vadd.f32 %v876_v50, %v831_v1 }
 0x1d2   :  { %v854_v43 = vadd.f32 %v853_v38, %v841_v13  ;;  %v759_v27 = vmax.f32 %v688_v29, 0.0  ;;  %v905_v13 = vpop.permute.xlu2 %904 }
 0x1d3   :  { %v611_v9 = vpop.f32.mrf.mxu0  ;;  %v867_v49 = vadd.f32 %v866_v54, %v842_v31  ;;  %v760_v46 = vmax.f32 %v729_v4, 0.0  ;;  %v890_v24 = vadd.f32 %v889_v58, %v832_v56  ;;  %v878_v51 = vadd.f32 %v877_v48, %v835_v5 }
 0x1d4   :  { %v612_v16 = vadd.f32 %v611_v9, %v1613_v53  ;;  %v652_v22 = vpop.f32.mrf.mxu1  ;;  %v839_v25 = vmul.f32 %v1621_v10, %v759_v27  ;;  %v907_v29 = vperm.slane %v905_v13, 0 }
 0x1d5   :  { %v653_v15 = vadd.f32 %v652_v22, %v1613_v53  ;;  %v840_v45 = vmul.f32 %v1621_v10, %v760_v46  ;;  %v891_v21 = vadd.f32 %v890_v24, %v836_v30 }
 0x1d6   :  { %v765_v32 = vmax.f32 %v612_v16, 0.0  ;;  %v879_v9 = vadd.f32 %v878_v51, %v839_v25 }
 0x1d7   :  { %v766_v28 = vmax.f32 %v653_v15, 0.0  ;;  %v690_v63 = vpop.f32.mrf.mxu2  ;;  %v892_v10 = vadd.f32 %v891_v21, %v840_v45 }
 0x1d8   :  { %v845_v44 = vmul.f32 %v815_v37, %v765_v32  ;;  %v691_v20 = vadd.f32 %v690_v63, %v1601_v8  ;;  %v731_v3 = vpop.f32.mrf.mxu3 }
 0x1d9   :  { %v846_v61 = vmul.f32 %v815_v37, %v766_v28  ;;  %v732_v19 = vadd.f32 %v731_v3, %v1601_v8 }
 0x1da   :  { %v855_v6 = vadd.f32 %v854_v43, %v845_v44  ;;  %v763_v11 = vmax.f32 %v691_v20, 0.0 }
 0x1db   :  { %v868_v34 = vadd.f32 %v867_v49, %v846_v61  ;;  %v764_v8 = vmax.f32 %v732_v19, 0.0 }
 0x1dc   :  { %v856_v40 = vrot.slane %v855_v6, 4  ;;  %v843_v60 = vmul.f32 %v1629_v59, %v763_v11 }
 0x1dd   :  { %v869_v12 = vrot.slane %v868_v34, 4  ;;  %v844_v0 = vmul.f32 %v1629_v59, %v764_v8 }
 0x1de   :  { %v857_v7 = vadd.f32 %v856_v40, %v855_v6  ;;  %v880_v62 = vadd.f32 %v879_v9, %v843_v60 }
 0x1df   :  { %v870_v2 = vadd.f32 %v869_v12, %v868_v34  ;;  %v693_v52 = vpop.f32.mrf.mxu2  ;;  %v893_v18 = vadd.f32 %v892_v10, %v844_v0 }
 0x1e0   :  { %v858_v55 = vrot.slane %v857_v7, 2  ;;  %v694_v26 = vadd.f32 %v693_v52, %v1613_v53  ;;  %v734_v35 = vpop.f32.mrf.mxu3 }
 0x1e1   :  { %v871_v36 = vrot.slane %v870_v2, 2  ;;  %v735_v47 = vadd.f32 %v734_v35, %v1613_v53 }
 0x1e2   :  { %v859_v57 = vadd.f32 %v858_v55, %v857_v7  ;;  %v767_v17 = vmax.f32 %v694_v26, 0.0 }
 0x1e3   :  { %v872_v16 = vadd.f32 %v871_v36, %v870_v2  ;;  %v768_v22 = vmax.f32 %v735_v47, 0.0 }
 0x1e4   :  { %v860_v14 = vrot.slane %v859_v57, 1  ;;  %v847_v31 = vmul.f32 %v815_v37, %v767_v17 }
 0x1e5   :  { %v873_v15 = vrot.slane %v872_v16, 1  ;;  %v848_v38 = vmul.f32 %v815_v37, %v768_v22 }
 0x1e6   :  { %v861_v32 = vadd.f32 %v860_v14, %v859_v57  ;;  %v881_v41 = vadd.f32 %v880_v62, %v847_v31 }
 0x1e7   :  { %v874_v54 = vadd.f32 %v873_v15, %v872_v16  ;;  %v894_v59 = vadd.f32 %v893_v18, %v848_v38 }
 0x1e8   :  { %v908_v4 = vadd.f32 %v907_v29, %v861_v32  ;;  %v882_v53 = vrot.slane %v881_v41, 4 }
 0x1e9   :  { %v909_v28 = vadd.f32 %v907_v29, %v874_v54  ;;  %v895_v63 = vrot.slane %v894_v59, 4 }
 0x1ea   :  { %v912_v42 = vsub.f32 0.0, %v908_v4  ;;  %v883_v43 = vadd.f32 %v882_v53, %v881_v41 }
 0x1eb   :  { %v913_v44 = vsub.f32 0.0, %v909_v28  ;;  %v896_v20 = vadd.f32 %v895_v63, %v894_v59 }
 0x1ec   :  { %v916_v3 = vmul.f32 1.442695, %v912_v42  ;;  %v884_v23 = vrot.slane %v883_v43, 2 }
 0x1ed   :  { %v918_v49 = vmul.f32 1.442695, %v913_v44  ;;  %v897_v61 = vrot.slane %v896_v20, 2 }
 0x1ee   :  { %1079 = vpow2.f32 %v916_v3  ;;  %v885_v19 = vadd.f32 %v884_v23, %v883_v43 }
 0x1ef   :  { %1081 = vpow2.f32 %v918_v49  ;;  %v898_v37 = vadd.f32 %v897_v61, %v896_v20  ;;  %v1002_v20 = vlaneseq }
 0x1f0   :  { %v886_v39 = vrot.slane %v885_v19, 1 }
 0x1f1   :  { %v899_v1 = vrot.slane %v898_v37, 1 }
 0x1f2   :  { %v887_v27 = vadd.f32 %v886_v39, %v885_v19 }
 0x1f3   :  { %v900_v6 = vadd.f32 %v899_v1, %v898_v37 }
 0x1f4   :  { %v1080_v33 = vpop.eup %1079  ;;  %v910_v56 = vadd.f32 %v907_v29, %v887_v27 }
 0x1f5   :  { %v1082_v46 = vpop.eup %1081  ;;  %v911_v34 = vadd.f32 %v907_v29, %v900_v6  ;;  %v1656_v40 = vadd.f32 1.0, %v1080_v33 }
 0x1f6   :  { %v925_v50 = vadd.f32 1.0, %v1082_v46  ;;  %v914_v5 = vsub.f32 0.0, %v910_v56 }
 0x1f7   :  { %v915_v58 = vsub.f32 0.0, %v911_v34  ;;  %vm933_vm2 = vweird.f32 %v1656_v40  ;;  %v939_v54 = vand.u32 2147483648, %v1656_v40  ;;  %v937_v28 = vand.u32 2147483647, %v1656_v40 }
 0x1f8   :  { %1083 = vrcp.f32 %v925_v50  ;;  %v920_v11 = vmul.f32 1.442695, %v914_v5  ;;  %v952_v26 = vand.u32 2147483647, %v925_v50  ;;  %v954_v36 = vand.u32 2147483648, %v925_v50 }
 0x1f9   :  { %v922_v30 = vmul.f32 1.442695, %v915_v58  ;;  %vm948_vm3 = vweird.f32 %v925_v50  ;;  %v940_v61 = vor.u32 1.1754944e-38, %v939_v54 }
 0x1fa   :  { %1085 = vpow2.f32 %v920_v11  ;;  %vm1669_vm5 = vcmp.eq.f32.partialorder %v952_v26, 8.507059e+37  ;;  %v955_v62 = vor.u32 1.1754944e-38, %v954_v36 }
 0x1fb   :  { %1087 = vrcp.f32 %v1656_v40 }
 0x1fc   :  { %1089 = vpow2.f32 %v922_v30 }
 0x1fe   :  { %v1084_v12 = vpop.eup %1083 }
 0x1ff   :  { %v944_v8 = vmul.f32 %v1084_v12, %v925_v50  ;;  %vm949_vm1 = vweird.f32 %v1084_v12 }
 0x200   :  { %v1086_v48 = vpop.eup %1085  ;;  %vm1665_vm4 = vmor %vm948_vm3, %vm949_vm1  ;;  %vm997_vm1 = vcmask 1042434   ;;  %vm999_vm3 = vcmask 1041408  }
 0x201   :  { %v1659_v25 = vpop.eup %1087  ;;  %v926_v7 = vadd.f32 1.0, %v1086_v48  ;;  %v945_v45 = vsub.f32 1.0, %v944_v8 }
 0x202   :  { %v1090_v24 = vpop.eup %1089  ;;  %v929_v2 = vmul.f32 %v1659_v25, %v1656_v40  ;;  %vm934_vm7 = vweird.f32 %v1659_v25 }
 0x203   :  { %1091 = vrcp.f32 %v926_v7  ;;  %v927_v52 = vadd.f32 1.0, %v1090_v24  ;;  %v946_v51 = vmul.f32 %v1084_v12, %v945_v45  ;;  %v969_v57 = vand.u32 2147483648, %v926_v7  ;;  %vm1684_vm12 = vmor %vm933_vm2, %vm934_vm7 }
 0x204   :  { %v930_v55 = vsub.f32 1.0, %v929_v2  ;;  %v967_v22 = vand.u32 2147483647, %v926_v7  ;;  %vm963_vm8 = vweird.f32 %v926_v7  ;;  %vm938_vm2 = vcmp.eq.f32.partialorder %v937_v28, 8.507059e+37 }
 0x205   :  { %1093 = vrcp.f32 %v927_v52  ;;  %v947_v21 = vadd.f32 %v1084_v12, %v946_v51  ;;  %v984_v38 = vand.u32 2147483648, %v927_v52  ;;  %v970_v29 = vor.u32 1.1754944e-38, %v969_v57 }
 0x206   :  { %v931_v47 = vmul.f32 %v1659_v25, %v930_v55  ;;  %v982_v41 = vand.u32 2147483647, %v927_v52  ;;  %vm968_vm11 = vcmp.eq.f32.partialorder %v967_v22, 8.507059e+37  ;;  %vm978_vm13 = vweird.f32 %v927_v52 }
 0x207   :  { %v951_v14 = vsel %vm1665_vm4, %v1084_v12, %v947_v21  ;;  %v985_v44 = vor.u32 1.1754944e-38, %v984_v38  ;;  %vm1004_vm4 = vcmp.lt.s32.totalorder %v1002_v20, 512 }
 0x208   :  { %v932_v15 = vadd.f32 %v1659_v25, %v931_v47  ;;  %v956_v59 = vsel %vm1669_vm5, %v955_v62, %v951_v14  ;;  %vm983_vm15 = vcmp.eq.f32.partialorder %v982_v41, 8.507059e+37 }
 0x209   :  { %v1092_v60 = vpop.eup %1091  ;;  %v992_v3 = vrot.slane %v956_v59, 7 }
 0x20a   :  { %v959_v35 = vmul.f32 %v1092_v60, %v926_v7  ;;  %vm964_vm6 = vweird.f32 %v1092_v60  ;;  %v936_v43 = vsel %vm1684_vm12, %v1659_v25, %v932_v15 }
 0x20b   :  { %v1094_v0 = vpop.eup %1093  ;;  %vm965_vm9 = vmor %vm963_vm8, %vm964_vm6  ;;  %v941_v39 = vsel %vm938_vm2, %v940_v61, %v936_v43 }
 0x20c   :  { %v960_v9 = vsub.f32 1.0, %v959_v35  ;;  %v974_v17 = vmul.f32 %v1094_v0, %v927_v52  ;;  %vm979_vm10 = vweird.f32 %v1094_v0  ;;  %v996_v1 = vsel %vm995_vm0, %v941_v39, %v992_v3 }
 0x20d   :  { %vm980_vm14 = vmor %vm978_vm13, %vm979_vm10 }
 0x20e   :  { %v961_v16 = vmul.f32 %v1092_v60, %v960_v9  ;;  %v975_v31 = vsub.f32 1.0, %v974_v17 }
 0x210   :  { %v962_v18 = vadd.f32 %v1092_v60, %v961_v16  ;;  %v976_v32 = vmul.f32 %v1094_v0, %v975_v31 }
 0x212   :  { %v966_v4 = vsel %vm965_vm9, %v1092_v60, %v962_v18  ;;  %v977_v42 = vadd.f32 %v1094_v0, %v976_v32 }
 0x213   :  { %v971_v63 = vsel %vm968_vm11, %v970_v29, %v966_v4 }
 0x214   :  { %v993_v23 = vrot.slane %v971_v63, 6  ;;  %v981_v49 = vsel %vm980_vm14, %v1094_v0, %v977_v42 }
 0x215   :  { %v986_v19 = vsel %vm983_vm15, %v985_v44, %v981_v49 }
 0x216   :  { %v994_v37 = vrot.slane %v986_v19, 5 }
 0x218   :  { %v998_v27 = vsel %vm997_vm1, %v993_v23, %v994_v37 }
 0x219   :  { %v1000_v6 = vsel %vm999_vm3, %v996_v1, %v998_v27 }
 0x21a   :  { %1006 = vst.msk [vmem:[%s1702_s7] sm:$0xf] %vm1004_vm4, %v1000_v6 }

</bundles_post_ra>
